<compile_context>
chip_gen: v7x
topology: tpu7x:2x2x1
jax: 0.10.0
libtpu: 0.0.40
codegen_flags: <defaults>
</compile_context>

<pallas_src>
import functools

import jax
import jax.numpy as jnp
import numpy as np
from jax.experimental import pallas as pl
from jax.experimental.pallas import tpu as pltpu

_LANES = 128


def _nll_partial_kernel(logits_ref, tgt_ref, out_ref, *, hw):
    """Per-block partial NLL sums.

    logits_ref: (C, BR, 128) input dtype (f32/bf16); class = leading plane axis,
                pixels on sublane x lane.
    tgt_ref   : (BR, 128)    target class per pixel (float or int storage).
    out_ref   : (8, 128)     f32 lane-dense partial-sum tile for this block.
    """
    p = pl.program_id(1)

    x = logits_ref[...].astype(jnp.float32)            # (C, BR, 128)
    tgt = tgt_ref[...].astype(jnp.int32)                # (BR, 128)  (.long())
    C, BR, L = x.shape

    # log-sum-exp over the class plane axis: per-lane VPU/EUP work only.
    m = jnp.max(x, axis=0)                              # (BR, 128)
    z = x - m[None, :, :]                               # (C, BR, 128)
    lse = jnp.log(jnp.sum(jnp.exp(z), axis=0))          # (BR, 128)

    # Gather the target-class logit with a one-hot plane select *before*
    # subtracting m/lse (no full (C,BR,128) logp tensor is materialized).
    # TODO(synk): out-of-range targets silently contribute 0 here (PyTorch
    # would error); acceptable when inputs are valid class indices.
    cls = jax.lax.broadcasted_iota(jnp.int32, x.shape, 0)          # (C,BR,128)
    picked = jnp.sum(jnp.where(cls == tgt[None, :, :], x, 0.0), axis=0)

    # -log p[target] per pixel.
    contrib = (m + lse) - picked                        # (BR, 128)

    # Mask pixels beyond the true H*W extent (ragged tail / block overhang).
    row = jax.lax.broadcasted_iota(jnp.int32, (BR, L), 0)
    lane = jax.lax.broadcasted_iota(jnp.int32, (BR, L), 1)
    flat = (p * BR + row) * L + lane
    contrib = jnp.where(flat < hw, contrib, 0.0)

    # Reduce to one lane-dense (8,128) partial tile per block: pure VPU adds
    # across planes when BR is sublane-aligned; a single small cross-sublane
    # reduce (once per block) otherwise.
    if BR % 8 == 0:
        partial = contrib.reshape(BR // 8, 8, L).sum(axis=0)
    else:
        rowsum = jnp.sum(contrib, axis=0, keepdims=True)            # (1,128)
        sub = jax.lax.broadcasted_iota(jnp.int32, (8, L), 0)
        partial = jnp.where(sub == 0, jnp.broadcast_to(rowsum, (8, L)), 0.0)
    out_ref[...] = partial


def nll_loss_2d(logits_nchw, target_n1hw, *, size_average=True):
    """Equivalent of NLLLoss2d(log_softmax(logits, dim=1), target.long().squeeze(1))."""
    N, C, H, W = logits_nchw.shape
    HW = H * W

    # Free reshapes only (no transpose): NCHW -> (N, C, HW); (N,1,H,W) -> (N, HW).
    logits = logits_nchw.reshape(N, C, HW)
    tgt = target_n1hw.reshape(N, HW)                    # squeeze(1) + flatten

    # Pad the flattened spatial axis to a multiple of 128 only when needed;
    # the in-kernel mask makes the pad values irrelevant.
    HW_pad = ((HW + _LANES - 1) // _LANES) * _LANES
    if HW_pad != HW:
        # TODO(synk): this pad is one extra HBM pass; only hit when H*W % 128 != 0.
        logits = jnp.pad(logits, ((0, 0), (0, 0), (0, HW_pad - HW)))
        tgt = jnp.pad(tgt, ((0, 0), (0, HW_pad - HW)))
    R = HW_pad // _LANES

    # Pixels on sublane x lane; class as a leading plane axis.
    logits = logits.reshape(N, C, R, _LANES)
    tgt = tgt.reshape(N, R, _LANES)

    # Rows (of 128 pixels) per block: ~1 MiB of f32 logits per block to
    # amortize per-step overhead, sublane-aligned, within scoped VMEM on
    # v5e (16 MiB default) / v6e / v7x even double-buffered.
    br = (1 * 1024 * 1024) // (C * _LANES * 4)
    br = max(8, min(1024, (br // 8) * 8))
    if br >= R:
        br = R                                          # block == full row axis
    gp = (R + br - 1) // br

    partials = pl.pallas_call(
        functools.partial(_nll_partial_kernel, hw=HW),
        out_shape=jax.ShapeDtypeStruct((N, gp, 8, _LANES), jnp.float32),
        grid_spec=pltpu.PrefetchScalarGridSpec(
            num_scalar_prefetch=0,
            grid=(N, gp),
            in_specs=[
                pl.BlockSpec((None, C, br, _LANES), lambda n, p: (n, 0, p, 0)),
                pl.BlockSpec((None, br, _LANES), lambda n, p: (n, p, 0)),
            ],
            out_specs=pl.BlockSpec((None, None, 8, _LANES),
                                   lambda n, p: (n, p, 0, 0)),
        ),
        compiler_params=pltpu.CompilerParams(
            dimension_semantics=("parallel", "parallel"),
            vmem_limit_bytes=32 * 1024 * 1024,
        ),
    )(logits, tgt)

    total = jnp.sum(partials)                           # tiny final reduction
    if size_average:
        total = total * (1.0 / (N * HW))
    return total


def nll_loss_forward(outputs, targets):
    """Mirror of NLLLoss.forward (weight=None, size_average=True)."""
    if not isinstance(outputs, (tuple, list)):
        # TODO(synk): the original non-iterable branch indexes outputs[0]/targets[0]
        # (drops the batch dim, legacy log_softmax dim quirk); we treat it as a
        # single (output, target) pair, which is the evident intent.
        outputs, targets = [outputs], [targets]
    loss = jnp.float32(0.0)
    for o, t in zip(outputs, targets):
        loss = loss + nll_loss_2d(o, t)
    return loss


def _reference(outputs, targets):
    """Pure-JAX reference for validation."""
    total = 0.0
    for o, t in zip(outputs, targets):
        logp = jax.nn.log_softmax(o, axis=1)                         # (N,C,H,W)
        tgt = jnp.squeeze(t.astype(jnp.int32), axis=1)               # (N,H,W)
        picked = jnp.take_along_axis(logp, tgt[:, None, :, :], axis=1)[:, 0]
        total = total + jnp.mean(-picked)
    return total


if __name__ == "__main__":
    key = jax.random.PRNGKey(0)
    k1, k2, k3, k4 = jax.random.split(key, 4)

    N, C, H, W = 2, 4, 16, 16
    out1 = jax.random.normal(k1, (N, C, H, W), dtype=jnp.float32)
    out2 = jax.random.normal(k2, (N, C, H, W), dtype=jnp.float32)
    # targets arrive as float tensors in the original module (.long() casts them)
    tgt1 = jax.random.randint(k3, (N, 1, H, W), 0, C).astype(jnp.float32)
    tgt2 = jax.random.randint(k4, (N, 1, H, W), 0, C).astype(jnp.float32)

    outputs = [out1, out2]
    targets = [tgt1, tgt2]

    loss = nll_loss_forward(outputs, targets)
    loss = jax.block_until_ready(loss)

    ref = jax.block_until_ready(_reference(outputs, targets))
    np.testing.assert_allclose(np.asarray(loss), np.asarray(ref), rtol=1e-5, atol=1e-5)

    print("KERNEL_OK")
</pallas_src>

<mosaic_0001>
module attributes {stable_mosaic.version = 11 : i64} {
  func.func @_nll_partial_kernel(%arg0: i32, %arg1: i32, %arg2: memref<1x4x2x128xf32, #tpu.memory_space<vmem>>, %arg3: memref<1x2x128xf32, #tpu.memory_space<vmem>>, %arg4: memref<1x1x8x128xf32, #tpu.memory_space<vmem>>) attributes {dimension_semantics = [#tpu.dimension_semantics<parallel>, #tpu.dimension_semantics<parallel>], iteration_bounds = array<i64: 2, 1>, scalar_prefetch = 0 : i64, scratch_operands = 0 : i64, tpu.core_type = #tpu.core_type<tc>, window_params = [{transform_indices = @transform_0, window_bounds = array<i64: 1, 4, 2, 128>}, {transform_indices = @transform_1, window_bounds = array<i64: 1, 2, 128>}, {transform_indices = @transform_2, window_bounds = array<i64: 1, 1, 8, 128>}]} {
    %c0 = arith.constant 0 : index
    %c0_0 = arith.constant 0 : index
    %c0_1 = arith.constant 0 : index
    %c0_2 = arith.constant 0 : index
    %0 = vector.load %arg2[%c0, %c0_0, %c0_1, %c0_2] : memref<1x4x2x128xf32, #tpu.memory_space<vmem>>, vector<1x4x2x128xf32>
    %1 = vector.shape_cast %0 : vector<1x4x2x128xf32> to vector<4x2x128xf32>
    %c0_3 = arith.constant 0 : index
    %c0_4 = arith.constant 0 : index
    %c0_5 = arith.constant 0 : index
    %2 = vector.load %arg3[%c0_3, %c0_4, %c0_5] : memref<1x2x128xf32, #tpu.memory_space<vmem>>, vector<1x2x128xf32>
    %3 = vector.shape_cast %2 : vector<1x2x128xf32> to vector<2x128xf32>
    %4 = arith.fptosi %3 : vector<2x128xf32> to vector<2x128xi32>
    %cst = arith.constant dense<0xFF800000> : vector<2x128xf32>
    %5 = vector.multi_reduction <maximumf>, %1, %cst [0] : vector<4x2x128xf32> to vector<2x128xf32>
    %6 = vector.shape_cast %5 : vector<2x128xf32> to vector<1x2x128xf32>
    %7 = vector.broadcast %6 : vector<1x2x128xf32> to vector<4x2x128xf32>
    %8 = arith.subf %1, %7 : vector<4x2x128xf32>
    %9 = math.exp %8 : vector<4x2x128xf32>
    %cst_6 = arith.constant dense<0.000000e+00> : vector<2x128xf32>
    %10 = vector.multi_reduction <add>, %9, %cst_6 [0] : vector<4x2x128xf32> to vector<2x128xf32>
    %11 = math.log %10 : vector<2x128xf32>
    %12 = tpu.iota {dimensions = array<i32: 0>} : vector<4x2x128xi32>
    %13 = vector.shape_cast %4 : vector<2x128xi32> to vector<1x2x128xi32>
    %14 = vector.broadcast %13 : vector<1x2x128xi32> to vector<4x2x128xi32>
    %15 = arith.cmpi eq, %12, %14 : vector<4x2x128xi32>
    %cst_7 = arith.constant 0.000000e+00 : f32
    %16 = vector.broadcast %cst_7 : f32 to vector<4x2x128xf32>
    %17 = arith.select %15, %1, %16 : vector<4x2x128xi1>, vector<4x2x128xf32>
    %cst_8 = arith.constant dense<0.000000e+00> : vector<2x128xf32>
    %18 = vector.multi_reduction <add>, %17, %cst_8 [0] : vector<4x2x128xf32> to vector<2x128xf32>
    %19 = arith.addf %5, %11 : vector<2x128xf32>
    %20 = arith.subf %19, %18 : vector<2x128xf32>
    %21 = tpu.iota {dimensions = array<i32: 0>} : vector<2x128xi32>
    %22 = tpu.iota {dimensions = array<i32: 1>} : vector<2x128xi32>
    %c2_i32 = arith.constant 2 : i32
    %23 = arith.muli %arg1, %c2_i32 : i32
    %24 = vector.broadcast %23 : i32 to vector<2x128xi32>
    %25 = arith.addi %24, %21 : vector<2x128xi32>
    %c128_i32 = arith.constant 128 : i32
    %26 = vector.broadcast %c128_i32 : i32 to vector<2x128xi32>
    %27 = arith.muli %25, %26 : vector<2x128xi32>
    %28 = arith.addi %27, %22 : vector<2x128xi32>
    %c256_i32 = arith.constant 256 : i32
    %29 = vector.broadcast %c256_i32 : i32 to vector<2x128xi32>
    %30 = arith.cmpi slt, %28, %29 : vector<2x128xi32>
    %cst_9 = arith.constant 0.000000e+00 : f32
    %31 = vector.broadcast %cst_9 : f32 to vector<2x128xf32>
    %32 = arith.select %30, %20, %31 : vector<2x128xi1>, vector<2x128xf32>
    %cst_10 = arith.constant dense<0.000000e+00> : vector<128xf32>
    %33 = vector.multi_reduction <add>, %32, %cst_10 [0] : vector<2x128xf32> to vector<128xf32>
    %34 = vector.shape_cast %33 : vector<128xf32> to vector<1x128xf32>
    %35 = tpu.iota {dimensions = array<i32: 0>} : vector<8x128xi32>
    %c0_i32 = arith.constant 0 : i32
    %36 = vector.broadcast %c0_i32 : i32 to vector<8x128xi32>
    %37 = arith.cmpi eq, %35, %36 : vector<8x128xi32>
    %38 = vector.shape_cast %34 : vector<1x128xf32> to vector<1x128xf32>
    %39 = vector.broadcast %38 : vector<1x128xf32> to vector<8x128xf32>
    %cst_11 = arith.constant 0.000000e+00 : f32
    %40 = vector.broadcast %cst_11 : f32 to vector<8x128xf32>
    %41 = arith.select %37, %39, %40 : vector<8x128xi1>, vector<8x128xf32>
    %c0_12 = arith.constant 0 : index
    %c0_13 = arith.constant 0 : index
    %c0_14 = arith.constant 0 : index
    %c0_15 = arith.constant 0 : index
    %42 = vector.load %arg4[%c0_12, %c0_13, %c0_14, %c0_15] : memref<1x1x8x128xf32, #tpu.memory_space<vmem>>, vector<1x1x8x128xf32>
    %43 = vector.shape_cast %42 : vector<1x1x8x128xf32> to vector<8x128xf32>
    %44 = vector.shape_cast %41 : vector<8x128xf32> to vector<1x1x8x128xf32>
    tpu.vector_store %arg4[%c0_12, %c0_13, %c0_14, %c0_15], %44 {strides = array<i32>} : memref<1x1x8x128xf32, #tpu.memory_space<vmem>>, vector<1x1x8x128xf32>,
    return
  }
  func.func @transform_0(%arg0: i32, %arg1: i32) -> (i32, i32, i32, i32) {
    %c0_i32 = arith.constant 0 : i32
    %c0_i32_0 = arith.constant 0 : i32
    %c0_i32_1 = arith.constant 0 : i32
    return %arg0, %c0_i32, %arg1, %c0_i32_0 : i32, i32, i32, i32
  }
  func.func @transform_1(%arg0: i32, %arg1: i32) -> (i32, i32, i32) {
    %c0_i32 = arith.constant 0 : i32
    %c0_i32_0 = arith.constant 0 : i32
    return %arg0, %arg1, %c0_i32 : i32, i32, i32
  }
  func.func @transform_2(%arg0: i32, %arg1: i32) -> (i32, i32, i32, i32) {
    %c0_i32 = arith.constant 0 : i32
    %c0_i32_0 = arith.constant 0 : i32
    %c0_i32_1 = arith.constant 0 : i32
    return %arg0, %arg1, %c0_i32, %c0_i32_0 : i32, i32, i32, i32
  }
}

</mosaic_0001>

<bundles_post_ra>
// kernel: tpu_custom_call.1
= control target key start
LH: loop header
LB: loop body
LE: loop exit
PB: predicated region body
PF: predicated region fallthrough
CT: control target
= control target key end

     0   :  { %7 = vsyncpa [#allocation3], 0  ;;  %s911_s0 = inlined_call_operand.hbm [shape: f32[2,4,2,128], index: 0, kind: input, shape index: {}]   ;;  %s912_s1 = inlined_call_operand.hbm [shape: f32[2,2,128], index: 1, kind: input, shape index: {}]   ;;  %s913_s2 = inlined_call_operand.hbm [shape: f32[2,1,8,128], index: 2, kind: output, shape index: {}]  }
   0x1   :  { %9 = vsyncpa [#allocation3 + $0x1], 0 }
   0x2   :  { %10 = vsyncpa [#allocation6], 0 }
   0x3   :  { %12 = vsyncpa [#allocation6 + $0x1], 0 }
   0x4   :  { %13 = vsyncpa [#allocation4], 0 }
   0x5   :  { %15 = vsyncpa [#allocation4 + $0x1], 0  ;;  %s679_s9 = smov 0   ;;  %s681_s10 = smov 0  }
   0x6   :  { %s683_s11 = smov 0   ;;  %s685_s12 = smov 0  }
   0x7   :  { %s687_s13 = smov 0   ;;  %s689_s14 = smov 0  }
   0x8 LB: > { %s412_s15 = sadd.s32 4294967295, %s657_s14   ;;  %s413_s16 = sadd.s32 4294967294, %s657_s14   ;;  %s657_s14 = sphi %s689_s14, %s21_s14   ;;  %s653_s13 = sphi %s687_s13, %s932_s13   ;;  %s649_s12 = sphi %s685_s12, %s931_s12   ;;  %s645_s11 = sphi %s683_s11, %s930_s11   ;;  %s641_s10 = sphi %s681_s10, %s929_s10   ;;  %s637_s9 = sphi %s679_s9, %s928_s9  }
   0x9   : > { %s33_s17 = sadd.s32 1, %s653_s13  ;;  %s42_s18 = sadd.s32 1, %s645_s11 }
   0xa   : > { %p35_p0 = scmp.ge.s32.totalorder %s33_s17, 2  ;;  %p49_p1 = scmp.ne.s32.totalorder %s645_s11, %s641_s10 }
   0xb   : > { %p50_p2 = scmp.eq.s32.totalorder %s657_s14, 0  ;;  %p55_p3 = scmp.ne.s32.totalorder %s641_s10, %s637_s9 }
   0xc   : > { %s934_s17 = smov (%p35_p0, %s33_s17), 0  ;;  %p56_p5 = scmp.eq.s32.totalorder %s412_s15, 0 }
   0xd   : > { %p720_p4 = por %p50_p2, %p49_p1  ;;  %s37_s20 = ssub.s32 %s653_s13, %s934_s17 }
   0xe   : > { %p109_p6 = scmp.eq.s32.totalorder %s412_s15, 1  ;;  %p40_p7 = scmp.eq.s32.totalorder %s37_s20, 0 }
   0xf   : > { %p726_p8 = por %p56_p5, %p55_p3  ;;  %p115_p10 = scmp.eq.s32.totalorder %s413_s16, 1 }
  0x10   : > { %p730_p9 = por %p109_p6, %p49_p1  ;;  %p449_p13 = scmp.lt.s32.totalorder %s657_s14, 2 }
  0x11   : > { %s917_s21 = scalar_select %p726_p8, 1, 0 }
  0x12   : > { %s918_s22 = scalar_select %p730_p9, 1, 0 }
  0x13   : > { %s735_s23 = scalar_select %p40_p7, %s645_s11, %s42_s18  }
  0x14   : > { %p737_p11 = por %p115_p10, %p55_p3  ;;  %s744_s25 = sand.u32 1, %s645_s11  }
  0x15   : > { %s416_s26 = sshll.u32 %s744_s25, 3  ;;  %s429_s27 = sshll.u32 %s653_s13, 7 }
  0x16   : > { %s919_s24 = scalar_select %p737_p11, 1, 0 }
  0x17   : > { %s751_s30 = scalar_lea.hbm %s911_s0, %s429_s27  ;;  %s139_s3 = scalar_lea.vmem [#allocation2], %s416_s26 }
  0x18   : > { %s147_s4 = sshll.u32 %s139_s3, 4  ;;  %p757_p0 = pnand %p449_p13, %p720_p4  ;;  %s753_s4 = int_to_ptr.vmem [resolvable:$true] %s147_s4 }
  0x19   : > { %s136_s6 = scalar_lea.sflag [#allocation3], %s744_s25  ;;  %s511_s7 = scalar_lea.hbm %s751_s30, 128 }
  0x1a   : > { %p512_p2 = scmp.ne.s32.totalorder %s751_s30, %s511_s7  ;;  %p513_p3 = pneg %p757_p0 }
  0x1b   : > { %s516_s16 = scalar_lea.hbm %s911_s0, 256  ;;  %p517_p4 = scmp.lt.u32.totalorder %s751_s30, %s911_s0 }
  0x1c   : > { %p514_p5 = pnand %p513_p3, %p512_p2  ;;  %p518_p7 = scmp.lt.u32.totalorder %s516_s16, %s511_s7 }
  0x1d   : > { %p520_p13 = scmp.lt.u32.totalorder %s511_s7, %s751_s30 }
  0x1e   : > { %p515_p6 = pneg %p514_p5  ;;  %p519_p10 = por %p518_p7, %p517_p4 }
  0x20   : > { %p521_p12 = por %p520_p13, %p519_p10 }
  0x22   : > { %p522_p1 = pnand %p521_p12, %p515_p6 }
  0x24   : > { %525 = shalt.err (!%p522_p1)
}
  0x25   : > { %s526_s20 = scalar_lea.vmem %s753_s4, 128  ;;  %s659_s26 = smov [#allocation2]  }
  0x26   : > { %p527_p2 = scmp.ne.s32.totalorder %s753_s4, %s526_s20  ;;  %s531_s27 = sshll.u32 %s659_s26, 4  ;;  %s532_s27 = int_to_ptr.vmem [resolvable:$false] %s531_s27 }
  0x27   : > { %s533_s28 = scalar_lea.vmem %s532_s27, 256  ;;  %p534_p9 = scmp.lt.s32.totalorder %s753_s4, %s532_s27 }
  0x28   : > { %p529_p5 = pnand %p527_p2, %p513_p3  ;;  %p535_p4 = scmp.lt.s32.totalorder %s533_s28, %s526_s20 }
  0x2a   : > { %p530_p11 = pneg %p529_p5  ;;  %p536_p7 = por %p535_p4, %p534_p9 }
  0x2c   : > { %p537_p10 = pnand %p536_p7, %p530_p11 }
  0x2e   : > { %540 = shalt.err (!%p537_p10)
}
  0x2f   : > { %s660_s29 = smov 32   ;;  %s661_s3 = smov 2  }
  0x30   : > { %441 = dma.hbm_to_vmem [thread:$0]  (!%p757_p0), %s751_s30, 128, %s753_s4, %s136_s6, %s660_s29, %s660_s29, %s661_s3  }
  0x31   : > { %p174_p12 = scmp.lt.s32.totalorder %s657_s14, 3  ;;  %s419_s7 = sshll.u32 %s744_s25, 1 }
  0x32   : > { %s420_s8 = sshll.u32 %s653_s13, 5  ;;  %p921_p9 = scmp.ge.s32.totalorder %s657_s14, 1 }
  0x33   : > { %s802_s19 = scalar_lea.hbm %s912_s1, %s420_s8  ;;  %s161_s20 = scalar_lea.vmem [#allocation5], %s419_s7 }
  0x34   : > { %p795_p11 = pnand %p921_p9, %p174_p12  ;;  %s169_s26 = sshll.u32 %s161_s20, 4  ;;  %s170_s26 = int_to_ptr.vmem [resolvable:$true] %s169_s26 }
  0x35   : > { %s158_s30 = scalar_lea.sflag [#allocation6], %s744_s25  ;;  %s541_s4 = scalar_lea.hbm %s802_s19, 32 }
  0x36   : > { %s922_s15 = scalar_select %p795_p11, 1, 0 }
  0x37   : > { %p542_p1 = scmp.ne.s32.totalorder %s802_s19, %s541_s4  ;;  %s546_s28 = scalar_lea.hbm %s912_s1, 64 }
  0x38   : > { %p547_p2 = scmp.lt.u32.totalorder %s802_s19, %s912_s1  ;;  %p548_p5 = scmp.lt.u32.totalorder %s546_s28, %s541_s4 }
  0x39   : > { %p544_p6 = pnand %p542_p1, %p513_p3  ;;  %p550_p7 = scmp.lt.u32.totalorder %s541_s4, %s802_s19 }
  0x3a   : > { %p549_p4 = por %p548_p5, %p547_p2 }
  0x3b   : > { %p545_p13 = pneg %p544_p6 }
  0x3c   : > { %p551_p10 = por %p550_p7, %p549_p4 }
  0x3e   : > { %p552_p12 = pnand %p551_p10, %p545_p13 }
  0x40   : > { %555 = shalt.err (!%p552_p12)
}
  0x41   : > { %s556_s25 = scalar_lea.vmem %s170_s26, 32  ;;  %s662_s7 = smov [#allocation5]  }
  0x42   : > { %p557_p9 = scmp.ne.s32.totalorder %s170_s26, %s556_s25  ;;  %s561_s8 = sshll.u32 %s662_s7, 4  ;;  %s562_s8 = int_to_ptr.vmem [resolvable:$false] %s561_s8 }
  0x43   : > { %s563_s16 = scalar_lea.vmem %s562_s8, 64  ;;  %p564_p8 = scmp.lt.s32.totalorder %s170_s26, %s562_s8 }
  0x44   : > { %p559_p1 = pnand %p557_p9, %p513_p3  ;;  %p565_p11 = scmp.lt.s32.totalorder %s563_s16, %s556_s25 }
  0x46   : > { %p560_p6 = pneg %p559_p1  ;;  %p566_p2 = por %p565_p11, %p564_p8 }
  0x48   : > { %p567_p5 = pnand %p566_p2, %p560_p6 }
  0x4a   : > { %570 = shalt.err (!%p567_p5)
}
  0x4b   : > { %444 = dma.hbm_to_vmem [thread:$0]  (!%p757_p0), %s802_s19, 32, %s170_s26, %s158_s30  }
  0x4c   : > { %p923_p13 = scmp.ne.s32.totalorder %s922_s15, 0 }
  0x4d   : > { %s827_s18 = sand.u32 (!%p923_p13), 1, %s641_s10   ;;  %p924_p8 = scmp.ne.s32.totalorder (!%p923_p13), %s917_s21, 0 }
  0x4e   : > { %178 = sbr.rel (%p923_p13) target bundleno = 165 (0xa5), region = 28  ;;  %s422_s20 = sshll.u32 (!%p923_p13), %s827_s18, 3 }
  0x4f   : > { %s181_s4 = scalar_lea.sflag (!%p923_p13), [#allocation3], %s827_s18  ;;  %s184_s6 = scalar_lea.vmem (!%p923_p13), [#allocation2], %s422_s20 }
  0x55   : > { %624 = dma.done.wait (%p924_p8), %s181_s4, 128  }
  0x56   : > { %626 = vsyncadd (%p924_p8), %s181_s4, 4294967168  ;;  %s423_s5 = sshll.u32 %s827_s18, 1  ;;  %s190_s15 = scalar_lea.sflag [#allocation6], %s827_s18 }
  0x57   : > { %s193_s19 = scalar_lea.vmem [#allocation5], %s423_s5 }
  0x58   : > { %628 = dma.done.wait (%p924_p8), %s190_s15, 32  }
  0x59   : > { %630 = vsyncadd (%p924_p8), %s190_s15, 4294967264  ;;  %vm225_vm0 = vcmask 1041408   ;;  %v219_v0 = vld [vmem:[%s184_s6] sm:$0x3]  ;;  %v220_v1 = vld [vmem:[%s184_s6 + $0x2] sm:$0x3]  ;;  %v271_v35 = vlaneseq }
  0x5a   : > { %v221_v2 = vld [vmem:[%s184_s6 + $0x4] sm:$0x3]  ;;  %v222_v3 = vld [vmem:[%s184_s6 + $0x6] sm:$0x3]  ;;  %v226_v4 = vsel %vm225_vm0, %v219_v0, -inf  ;;  %v227_v5 = vsel %vm225_vm0, %v220_v1, -inf }
  0x5b   : > { %v228_v6 = vsel %vm225_vm0, %v221_v2, -inf  ;;  %v229_v7 = vsel %vm225_vm0, %v222_v3, -inf  ;;  %v230_v8 = vmax.f32 %v226_v4, %v227_v5  ;;  %v223_v19 = vld [vmem:[%s193_s19] sm:$0x3]  ;;  %v272_v39 = vshrl.u32 %v271_v35, 7  ;;  %s218_s21 = scalar_lea.vmem [#allocation7], %s422_s20 }
  0x5c   : > { %v231_v9 = vmax.f32 %v228_v6, %v229_v7  ;;  %v430_v20 = vtrunc.f32 %v223_v19  ;;  %v274_v43 = vand.u32 127, %v271_v35  ;;  %s307_s26 = sshll.u32 %s218_s21, 4  ;;  %s426_s30 = sshll.u32 %s649_s12, 7  ;;  %s859_s26 = int_to_ptr.vmem [resolvable:$true] %s307_s26 }
  0x5d   : > { %v278_v44 = vmul.u32 128, %v272_v39  ;;  %vm289_vm6 = vcmp.eq.s32.totalorder %v272_v39, 0  ;;  %s864_s29 = scalar_lea.hbm %s913_s2, %s426_s30  ;;  %s293_s3 = scalar_lea.sflag [#allocation4], %s827_s18 }
  0x5e   : > { %v232_v10 = vmax.f32 %v230_v8, %v231_v9  ;;  %v431_v21 = vcvt.f32.s32 %v430_v20  ;;  %s571_s25 = scalar_lea.vmem %s859_s26, 128  ;;  %p925_p3 = scmp.ne.s32.totalorder %s918_s22, 0 }
  0x5f   : > { %v279_v48 = vadd.s32 %v278_v44, %v274_v43  ;;  %p572_p0 = scmp.ne.s32.totalorder %s859_s26, %s571_s25  ;;  %s663_s12 = smov [#allocation7]  }
  0x60   : > { %v233_v11 = vsub.f32 %v219_v0, %v232_v10  ;;  %v234_v12 = vsub.f32 %v220_v1, %v232_v10  ;;  %v235_v13 = vsub.f32 %v221_v2, %v232_v10  ;;  %v236_v14 = vsub.f32 %v222_v3, %v232_v10  ;;  %s575_s7 = sshll.u32 %s663_s12, 4  ;;  %s576_s7 = int_to_ptr.vmem [resolvable:$false] %s575_s7 }
  0x61   : > { %vm254_vm1 = vcmp.eq.s32.totalorder %v431_v21, 0  ;;  %vm255_vm2 = vcmp.eq.s32.totalorder %v431_v21, 1  ;;  %vm256_vm3 = vcmp.eq.s32.totalorder %v431_v21, 2  ;;  %vm257_vm4 = vcmp.eq.s32.totalorder %v431_v21, 3  ;;  %p573_p11 = pnand %p572_p0, %p925_p3  ;;  %s577_s8 = scalar_lea.vmem %s576_s7, 256 }
  0x62   : > { %v237_v15 = vmul.f32 1.442695, %v233_v11  ;;  %v239_v16 = vmul.f32 1.442695, %v234_v12  ;;  %v241_v17 = vmul.f32 1.442695, %v235_v13  ;;  %p578_p7 = scmp.lt.s32.totalorder %s859_s26, %s576_s7  ;;  %p579_p10 = scmp.lt.s32.totalorder %s577_s8, %s571_s25 }
  0x63   : > { %v243_v18 = vmul.f32 1.442695, %v236_v14  ;;  %v258_v32 = vsel %vm254_vm1, %v219_v0, 0.0  ;;  %v259_v33 = vsel %vm255_vm2, %v220_v1, 0.0  ;;  %v260_v38 = vsel %vm256_vm3, %v221_v2, 0.0  ;;  %p574_p4 = pneg %p573_p11 }
  0x64   : > { %501 = vpow2.f32 %v237_v15  ;;  %v262_v36 = vsel %vm225_vm0, %v258_v32, 0.0  ;;  %v263_v37 = vsel %vm225_vm0, %v259_v33, 0.0  ;;  %v265_v41 = vsel %vm225_vm0, %v260_v38, 0.0  ;;  %p580_p12 = por %p579_p10, %p578_p7 }
  0x65   : > { %503 = vpow2.f32 %v239_v16  ;;  %v264_v40 = vadd.f32 %v263_v37, %v262_v36  ;;  %v261_v42 = vsel %vm257_vm4, %v222_v3, 0.0  ;;  %vm280_vm5 = vcmp.lt.s32.totalorder %v279_v48, 256 }
  0x66   : > { %505 = vpow2.f32 %v241_v17  ;;  %v267_v46 = vsel %vm225_vm0, %v261_v42, 0.0  ;;  %p581_p9 = pnand %p580_p12, %p574_p4 }
  0x67   : > { %507 = vpow2.f32 %v243_v18  ;;  %v266_v45 = vadd.f32 %v265_v41, %v264_v40 }
  0x69   : > { %v268_v50 = vadd.f32 %v267_v46, %v266_v45 }
  0x6e   : > { %v502_v22 = vpop.eup %501 }
  0x6f   : > { %v504_v23 = vpop.eup %503  ;;  %v245_v24 = vsel %vm225_vm0, %v502_v22, 0.0 }
  0x70   : > { %v506_v25 = vpop.eup %505  ;;  %v246_v26 = vsel %vm225_vm0, %v504_v23, 0.0 }
  0x71   : > { %v508_v27 = vpop.eup %507  ;;  %v247_v28 = vadd.f32 %v246_v26, %v245_v24  ;;  %v248_v29 = vsel %vm225_vm0, %v506_v25, 0.0 }
  0x72   : > { %v250_v30 = vsel %vm225_vm0, %v508_v27, 0.0 }
  0x73   : > { %v249_v31 = vadd.f32 %v248_v29, %v247_v28 }
  0x75   : > { %v251_v34 = vadd.f32 %v250_v30, %v249_v31 }
  0x77   : > { %509 = vlog2.f32 %v251_v34 }
  0x81   : > { %v510_v47 = vpop.eup %509 }
  0x82   : > { %v253_v49 = vmul.f32 0.6931472, %v510_v47 }
  0x84   : > { %v269_v51 = vadd.f32 %v253_v49, %v232_v10 }
  0x86   : > { %v270_v52 = vsub.f32 %v269_v51, %v268_v50 }
  0x88   : > { %v281_v53 = vsel %vm280_vm5, %v270_v52, 0.0 }
  0x89   : > { %v282_v54 = vsel %vm225_vm0, %v281_v53, 0.0 }
  0x8a   : > { %v283_v55 = vrot.slane %v282_v54, 4 }
  0x8c   : > { %v284_v56 = vadd.f32 %v283_v55, %v282_v54 }
  0x8e   : > { %v285_v57 = vrot.slane %v284_v56, 2 }
  0x90   : > { %v286_v58 = vadd.f32 %v285_v57, %v284_v56 }
  0x92   : > { %v287_v59 = vrot.slane %v286_v58, 1 }
  0x94   : > { %v288_v60 = vadd.f32 %v287_v59, %v286_v58 }
  0x96   : > { %v290_v61 = vsel %vm289_vm6, %v288_v60, 0.0 }
  0x97   : > { %291 = vst [vmem:[%s218_s21] sm:$0xff] %v290_v61 }
  0x98   : > { %584 = shalt.err (!%p581_p9)
}
  0x99   : > { %s585_s16 = scalar_lea.hbm %s864_s29, 128  ;;  %s589_s4 = scalar_lea.hbm %s913_s2, 256 }
  0x9a   : > { %p586_p1 = scmp.ne.s32.totalorder %s864_s29, %s585_s16  ;;  %p590_p5 = scmp.lt.u32.totalorder %s864_s29, %s913_s2 }
  0x9b   : > { %p591_p13 = scmp.lt.u32.totalorder %s589_s4, %s585_s16  ;;  %p593_p0 = scmp.lt.u32.totalorder %s585_s16, %s864_s29 }
  0x9c   : > { %p587_p6 = pnand %p586_p1, %p925_p3 }
  0x9d   : > { %p592_p8 = por %p591_p13, %p590_p5 }
  0x9e   : > { %p588_p2 = pneg %p587_p6 }
  0x9f   : > { %p594_p11 = por %p593_p0, %p592_p8 }
  0xa1   : > { %p595_p4 = pnand %p594_p11, %p588_p2 }
  0xa3   : > { %598 = shalt.err (!%p595_p4)
}
  0xa4   : > { %436 = dma.vmem_to_hbm [thread:$0]  (%p925_p3), %s859_s26, 128, %s864_s29, %s293_s3  }
  0xa5 PF: > { %s319_s15 = sand.u32 1, %s637_s9   ;;  %p926_p7 = scmp.ne.s32.totalorder %s919_s24, 0 }
  0xa6   : > { %p927_p10 = scmp.ge.s32.totalorder %s657_s14, 2  ;;  %s320_s19 = scalar_lea.sflag [#allocation4], %s319_s15 }
  0xa8   : > { %p446_p12 = pnand %p927_p10, %p926_p7 }
  0xaa   : > { %632 = dma.done.wait (!%p446_p12), %s320_s19, 128  }
  0xab   : > { %634 = vsyncadd (!%p446_p12), %s320_s19, 4294967168  ;;  %s21_s14 = sadd.s32 1, %s657_s14   ;;  %s928_s9 = smov %s641_s10 }
  0xac   : > { %p18_p9 = scmp.ge.s32.totalorder %s21_s14, 4   ;;  %s929_s10 = smov %s645_s11 }
  0xad   : > { %s930_s11 = smov %s735_s23  ;;  %s931_s12 = smov %s653_s13 }
  0xae   : > { %s932_s13 = smov %s934_s17  ;;  %20 = sbr.rel (!%p18_p9) target bundleno = 8 (0x8), region = 86 }
  0xb5   :  { %325 = vsyncpa [#allocation3], 1 }
  0xb6   :  { %327 = vsyncpa [#allocation3 + $0x1], 1 }
  0xb7   :  { %328 = vsyncpa [#allocation6], 1 }
  0xb8   :  { %330 = vsyncpa [#allocation6 + $0x1], 1 }
  0xb9   :  { %331 = vsyncpa [#allocation4], 1 }
  0xba   :  { %333 = vsyncpa [#allocation4 + $0x1], 1 }

</bundles_post_ra>
